<compile_context>
chip_gen: v7x
topology: tpu7x:2x2x1
jax: 0.10.0
libtpu: 0.0.40
codegen_flags: <defaults>
</compile_context>

<pallas_src>
import functools

import jax
import jax.numpy as jnp
from jax.experimental import pallas as pl
from jax.experimental.pallas import tpu as pltpu

TIMESTEP = 10  # matches DirectEncoder(timestep=10)


def _broadcast_kernel(x_ref, o_ref):
    # x_ref: (tm, N) input tile, resident across the inner timestep grid axis.
    # o_ref: (tt, tm, N) output block -> write tt copies of the tile at once.
    o_ref[...] = jnp.broadcast_to(x_ref[...][None], o_ref.shape)


def _choose_layout(shape):
    """Flatten to (M, N) with N a multiple of 128 whenever possible so every
    output write is a lane-dense, unmasked vst."""
    if not shape:
        return 1, 1
    total = 1
    for d in shape:
        total *= int(d)
    for n in (4096, 2048, 1024, 512, 256, 128):
        if total % n == 0:
            return total // n, n
    # TODO(synk): for bf16/int8 inputs whose element count is not 128-divisible,
    # pack pairs/quads into 32-bit containers (pltpu.bitcast) before flattening
    # so the lane dim can still be 128-aligned; for now fall back to the natural
    # last dim (correct, but masked partial stores).
    lead = 1
    for d in shape[:-1]:
        lead *= int(d)
    return max(lead, 1), int(shape[-1])


@functools.lru_cache(maxsize=1)
def _chip_profile():
    """Return (target_tile_bytes, vmem_limit_bytes_or_None, try_core_parallel)."""
    kind = ""
    try:
        kind = jax.devices()[0].device_kind.lower()
    except Exception:
        pass
    vmem_cap = None
    try:
        vmem_cap = int(pltpu.get_tpu_info().vmem_capacity_bytes)
    except Exception:
        pass

    if "v7" in kind or "7x" in kind:
        # 64 MiB physical VMEM, 3.2 TB/s HBM, 2 TensorCores per chip.
        target, limit, core_par = 8 << 20, 40 << 20, True
    elif "v6" in kind:
        # 128 MiB physical VMEM, 1.4 TB/s HBM.
        target, limit, core_par = 8 << 20, 48 << 20, False
    elif "v5 lite" in kind or "v5lite" in kind or "v5e" in kind:
        # 16 MiB scoped default, 128 MiB physical; 820 GB/s HBM -> 4 MiB tiles
        # already keep step overhead under ~15%.
        target, limit, core_par = 4 << 20, 32 << 20, False
    elif "v5" in kind or "v4" in kind:
        # v5p / v4: large VMEM, fast HBM.
        target, limit, core_par = 8 << 20, 48 << 20, False
    else:
        # Unknown chip: conservative (fits the default scoped VMEM limit).
        target, limit, core_par = 2 << 20, None, False

    if vmem_cap:
        # Double-buffered (2*in + 2*out) footprint ~= 4 * target; keep it
        # well under physical VMEM.
        target = max(512 << 10, min(target, vmem_cap // 8))
        if limit is not None:
            limit = min(limit, (vmem_cap * 3) // 4)
    return target, limit, core_par


def direct_encoder(
    x: jnp.ndarray,
    timestep: int = TIMESTEP,
    *,
    target_tile_bytes: int | None = None,
    vmem_limit_bytes: int | None = None,
) -> jnp.ndarray:
    """Pallas equivalent of DirectEncoder.forward.

    x: (B, C, H, W) -> out: (timestep, B, C, H, W), out[t] == x (bit-exact).
    """
    orig_shape = tuple(x.shape)
    M, N = _choose_layout(orig_shape)
    x2d = x.reshape(M, N)
    itemsize = jnp.dtype(x.dtype).itemsize
    row_bytes = N * itemsize
    slab_bytes = M * row_bytes

    prof_target, prof_limit, core_par = _chip_profile()
    target = int(target_tile_bytes) if target_tile_bytes else prof_target
    vmem_limit = vmem_limit_bytes if vmem_limit_bytes is not None else prof_limit

    # ---- tile the flattened row axis (M) ----
    tm = max(1, target // row_bytes)
    if tm >= M or M <= 8:
        tm = M                              # full extent: always layout-legal
    else:
        tm = min(M, max(8, (tm // 8) * 8))  # keep second-minor dim 8-aligned

    # v7x core-parallel split only helps if both cores own M tiles.
    if core_par and M >= 16 and pl.cdiv(M, tm) < 2:
        tm = min(M, max(8, (((M + 1) // 2 + 7) // 8) * 8))

    tile_bytes = tm * row_bytes

    # If the full-M tile is still far below the target (small inputs), fold
    # timesteps into the output block so each grid step writes ~target bytes.
    if tm == M and tile_bytes < target:
        tt = int(min(timestep, max(1, target // tile_bytes)))
    else:
        tt = 1

    grid_m = pl.cdiv(M, tm)
    grid_t = pl.cdiv(timestep, tt)

    cost = pl.CostEstimate(
        flops=0,
        transcendentals=0,
        bytes_accessed=(timestep + 1) * slab_bytes,  # 1 read + T writes
    )

    def _call(dim_semantics):
        return pl.pallas_call(
            _broadcast_kernel,
            out_shape=jax.ShapeDtypeStruct((timestep, M, N), x.dtype),
            grid_spec=pltpu.PrefetchScalarGridSpec(
                num_scalar_prefetch=0,
                grid=(grid_m, grid_t),
                in_specs=[
                    # Block index is constant across the inner timestep axis ->
                    # each input tile is fetched from HBM exactly once.
                    pl.BlockSpec((tm, N), lambda i, t: (i, 0)),
                ],
                out_specs=pl.BlockSpec((tt, tm, N), lambda i, t: (t, i, 0)),
            ),
            compiler_params=pltpu.CompilerParams(
                dimension_semantics=dim_semantics,
                vmem_limit_bytes=vmem_limit,
            ),
            cost_estimate=cost,
        )(x2d)

    # Prefer a real two-TensorCore split on v7x; fall back to the plain tag.
    attempts = []
    if core_par and grid_m >= 2:
        attempts.append((pltpu.CORE_PARALLEL, pltpu.ARBITRARY))
    attempts.append(("parallel", "arbitrary"))

    out2d = None
    last_err = None
    for sem in attempts:
        try:
            out2d = _call(sem)
            break
        except Exception as e:  # fall back if CORE_PARALLEL is rejected
            last_err = e
    if out2d is None:
        raise last_err

    return out2d.reshape((timestep,) + orig_shape)


if __name__ == "__main__":
    key = jax.random.PRNGKey(0)

    # Test 1: module-sized input -> single grid step (timestep-folded block).
    B, C, H, W = 2, 4, 16, 16
    x = jax.random.normal(key, (B, C, H, W), dtype=jnp.float32)
    out = jax.block_until_ready(direct_encoder(x, TIMESTEP))
    ref = jnp.broadcast_to(x[None], (TIMESTEP, B, C, H, W))
    assert out.shape == (TIMESTEP, B, C, H, W), out.shape
    assert out.dtype == x.dtype
    assert bool(jnp.array_equal(out, ref))

    # Test 2: force the tiled (M-outer, timestep-inner) path with small tiles.
    B2, C2, H2, W2 = 8, 8, 32, 32
    x2 = jax.random.normal(jax.random.PRNGKey(1), (B2, C2, H2, W2), jnp.float32)
    out2 = jax.block_until_ready(
        direct_encoder(x2, TIMESTEP, target_tile_bytes=32 * 1024)
    )
    ref2 = jnp.broadcast_to(x2[None], (TIMESTEP, B2, C2, H2, W2))
    assert out2.shape == (TIMESTEP, B2, C2, H2, W2), out2.shape
    assert bool(jnp.array_equal(out2, ref2))

    # Test 3: force timestep folding with a partial last t-block (bf16 input).
    x3 = jax.random.normal(jax.random.PRNGKey(2), (1, 2, 8, 128), jnp.float32)
    x3 = x3.astype(jnp.bfloat16)
    out3 = jax.block_until_ready(
        direct_encoder(x3, TIMESTEP, target_tile_bytes=32 * 1024)
    )
    ref3 = jnp.broadcast_to(x3[None], (TIMESTEP,) + x3.shape)
    assert out3.shape == (TIMESTEP,) + x3.shape, out3.shape
    assert out3.dtype == x3.dtype
    assert bool(jnp.array_equal(out3, ref3))

    # Test 4: element count not divisible by 128 -> fallback layout path.
    x4 = jax.random.normal(jax.random.PRNGKey(3), (2, 3, 5, 7), jnp.float32)
    out4 = jax.block_until_ready(direct_encoder(x4, TIMESTEP))
    ref4 = jnp.broadcast_to(x4[None], (TIMESTEP,) + x4.shape)
    assert out4.shape == (TIMESTEP,) + x4.shape, out4.shape
    assert bool(jnp.array_equal(out4, ref4))

    print("KERNEL_OK")
</pallas_src>

<mosaic_0001>
module attributes {stable_mosaic.version = 11 : i64} {
  func.func @_broadcast_kernel(%arg0: i32, %arg1: i32, %arg2: memref<1x2048xf32, #tpu.memory_space<vmem>>, %arg3: memref<10x1x2048xf32, #tpu.memory_space<vmem>>) attributes {dimension_semantics = [#tpu.dimension_semantics<parallel>, #tpu.dimension_semantics<arbitrary>], iteration_bounds = array<i64: 1, 1>, scalar_prefetch = 0 : i64, scratch_operands = 0 : i64, tpu.core_type = #tpu.core_type<tc>, window_params = [{transform_indices = @transform_0, window_bounds = array<i64: 1, 2048>}, {transform_indices = @transform_1, window_bounds = array<i64: 10, 1, 2048>}]} {
    %c0 = arith.constant 0 : index
    %c0_0 = arith.constant 0 : index
    %0 = vector.load %arg2[%c0, %c0_0] : memref<1x2048xf32, #tpu.memory_space<vmem>>, vector<1x2048xf32>
    %1 = vector.shape_cast %0 : vector<1x2048xf32> to vector<1x1x2048xf32>
    %2 = vector.shape_cast %1 : vector<1x1x2048xf32> to vector<1x1x2048xf32>
    %3 = vector.broadcast %2 : vector<1x1x2048xf32> to vector<10x1x2048xf32>
    %c0_1 = arith.constant 0 : index
    %c0_2 = arith.constant 0 : index
    %c0_3 = arith.constant 0 : index
    %4 = vector.load %arg3[%c0_1, %c0_2, %c0_3] : memref<10x1x2048xf32, #tpu.memory_space<vmem>>, vector<10x1x2048xf32>
    tpu.vector_store %arg3[%c0_1, %c0_2, %c0_3], %3 {strides = array<i32>} : memref<10x1x2048xf32, #tpu.memory_space<vmem>>, vector<10x1x2048xf32>,
    return
  }
  func.func @transform_0(%arg0: i32, %arg1: i32) -> (i32, i32) {
    %c0_i32 = arith.constant 0 : i32
    %c0_i32_0 = arith.constant 0 : i32
    return %arg0, %c0_i32 : i32, i32
  }
  func.func @transform_1(%arg0: i32, %arg1: i32) -> (i32, i32, i32) {
    %c0_i32 = arith.constant 0 : i32
    %c0_i32_0 = arith.constant 0 : i32
    return %arg1, %arg0, %c0_i32 : i32, i32, i32
  }
}

</mosaic_0001>

<bundles_post_ra>
// kernel: tpu_custom_call.1
= control target key start
LH: loop header
LB: loop body
LE: loop exit
PB: predicated region body
PF: predicated region fallthrough
CT: control target
= control target key end

     0   :  { %6 = vsyncpa [#allocation3], 0  ;;  %s157_s0 = inlined_call_operand.hbm [shape: f32[1,2048], index: 0, kind: input, shape index: {}]   ;;  %s158_s1 = inlined_call_operand.hbm [shape: f32[10,1,2048], index: 1, kind: output, shape index: {}]  }
   0x1   :  { %7 = vsyncpa [#allocation4], 0  ;;  %s112_s6 = smov [#allocation2]   ;;  %s64_s10 = scalar_lea.hbm %s157_s0, 256 }
   0x2   :  { %s14_s7 = sshll.u32 %s112_s6, 4  ;;  %p65_p0 = scmp.ne.s32.totalorder %s157_s0, %s64_s10  ;;  %s15_s7 = int_to_ptr.vmem [resolvable:$true] %s14_s7 }
   0x3   :  { %p68_p1 = scmp.lt.u32.totalorder %s64_s10, %s157_s0 }
   0x5   :  { %p70_p2 = pnand %p68_p1, %p65_p0 }
   0x7   :  { %73 = shalt.err (!%p70_p2)
}
   0x8   :  { %s74_s15 = scalar_lea.vmem %s15_s7, 256  ;;  %p79_p4 = scmp.lt.s32.totalorder %s15_s7, %s15_s7 }
   0x9   :  { %p75_p3 = scmp.ne.s32.totalorder %s15_s7, %s74_s15  ;;  %p80_p5 = scmp.lt.s32.totalorder %s74_s15, %s74_s15 }
   0xb   :  { %p81_p6 = por %p80_p5, %p79_p4 }
   0xd   :  { %p82_p7 = pnand %p81_p6, %p75_p3 }
   0xf   :  { %85 = shalt.err (!%p82_p7)
}
  0x10   :  { %17 = dma.hbm_to_vmem [thread:$0]  %s157_s0, 256, %s15_s7, [#allocation3]  }
  0x11   :  { %108 = dma.done.wait [#allocation3], 256  }
  0x12   :  { %109 = vsyncadd [#allocation3], 4294967040  ;;  %s113_s18 = smov [#allocation5]   ;;  %v21_v0 = vld [vmem:[#allocation2] sm:$0xff]  ;;  %v22_v1 = vld [vmem:[#allocation2 + $0x8] sm:$0xff] }
  0x13   :  { %s48_s19 = sshll.u32 %s113_s18, 4  ;;  %23 = vst [vmem:[#allocation5] sm:$0xff] %v21_v0  ;;  %25 = vst [vmem:[#allocation5 + $0x10] sm:$0xff] %v21_v0  ;;  %s138_s19 = int_to_ptr.vmem [resolvable:$true] %s48_s19 }
  0x14   :  { %27 = vst [vmem:[#allocation5 + $0x20] sm:$0xff] %v21_v0  ;;  %29 = vst [vmem:[#allocation5 + $0x30] sm:$0xff] %v21_v0  ;;  %s86_s0 = scalar_lea.vmem %s138_s19, 2560  ;;  %p91_p9 = scmp.lt.s32.totalorder %s138_s19, %s138_s19 }
  0x15   :  { %31 = vst [vmem:[#allocation5 + $0x40] sm:$0xff] %v21_v0  ;;  %33 = vst [vmem:[#allocation5 + $0x50] sm:$0xff] %v21_v0  ;;  %p87_p8 = scmp.ne.s32.totalorder %s138_s19, %s86_s0  ;;  %p92_p10 = scmp.lt.s32.totalorder %s86_s0, %s86_s0 }
  0x16   :  { %35 = vst [vmem:[#allocation5 + $0x60] sm:$0xff] %v21_v0  ;;  %37 = vst [vmem:[#allocation5 + $0x70] sm:$0xff] %v21_v0 }
  0x17   :  { %39 = vst [vmem:[#allocation5 + $0x80] sm:$0xff] %v21_v0  ;;  %41 = vst [vmem:[#allocation5 + $0x90] sm:$0xff] %v21_v0  ;;  %p93_p11 = por %p92_p10, %p91_p9 }
  0x18   :  { %24 = vst [vmem:[#allocation5 + $0x8] sm:$0xff] %v22_v1  ;;  %26 = vst [vmem:[#allocation5 + $0x18] sm:$0xff] %v22_v1 }
  0x19   :  { %28 = vst [vmem:[#allocation5 + $0x28] sm:$0xff] %v22_v1  ;;  %30 = vst [vmem:[#allocation5 + $0x38] sm:$0xff] %v22_v1  ;;  %p94_p12 = pnand %p93_p11, %p87_p8 }
  0x1a   :  { %32 = vst [vmem:[#allocation5 + $0x48] sm:$0xff] %v22_v1  ;;  %34 = vst [vmem:[#allocation5 + $0x58] sm:$0xff] %v22_v1 }
  0x1b   :  { %36 = vst [vmem:[#allocation5 + $0x68] sm:$0xff] %v22_v1  ;;  %38 = vst [vmem:[#allocation5 + $0x78] sm:$0xff] %v22_v1 }
  0x1c   :  { %40 = vst [vmem:[#allocation5 + $0x88] sm:$0xff] %v22_v1  ;;  %42 = vst [vmem:[#allocation5 + $0x98] sm:$0xff] %v22_v1 }
  0x1d   :  { %97 = shalt.err (!%p94_p12)
}
  0x1e   :  { %s98_s22 = scalar_lea.hbm %s158_s1, 2560 }
  0x1f   :  { %p99_p13 = scmp.ne.s32.totalorder %s158_s1, %s98_s22  ;;  %p102_p0 = scmp.lt.u32.totalorder %s98_s22, %s158_s1 }
  0x21   :  { %p104_p1 = pnand %p102_p0, %p99_p13 }
  0x23   :  { %107 = shalt.err (!%p104_p1)
}
  0x24   :  { %s114_s27 = smov 256   ;;  %s115_s28 = smov 16  }
  0x25   :  { %54 = dma.vmem_to_hbm [thread:$0]  %s138_s19, 2560, %s158_s1, [#allocation4], %s114_s27, %s114_s27, %s115_s28  }
  0x26   :  { %110 = dma.done.wait [#allocation4], 2560  }
  0x27   :  { %111 = vsyncadd [#allocation4], 4294964736 }
  0x28   :  { %58 = vsyncpa [#allocation3], 1 }
  0x29   :  { %59 = vsyncpa [#allocation4], 1 }

</bundles_post_ra>
